<compile_context>
chip_gen: v6e
topology: v6e:2x2x1
jax: 0.10.0
libtpu: 0.0.40
codegen_flags: <defaults>
</compile_context>

<pallas_src>
import jax
import jax.numpy as jnp
from jax import lax
from jax.experimental import pallas as pl
from jax.experimental.pallas import tpu as pltpu


def model_kernel(x_ref, w_big_ref, b_big_ref, w_fc_ref, b_fc_ref, out_ref):
    # One fused matmul produces [cls0 | cls1] directly (block-diagonal weight):
    # pooling, both branch Linears and the concat are all inside this dot.
    cls = (jnp.dot(x_ref[...], w_big_ref[...],
                   preferred_element_type=jnp.float32)
           + b_big_ref[...])                                     # (bm, 8) f32

    # Exact GELU (matches torch F.gelu default, erf formulation).
    inv_sqrt2 = jnp.float32(0.7071067811865476)
    cls = 0.5 * cls * (1.0 + lax.erf(cls * inv_sqrt2))

    # Head: nn.Linear(8, 4).
    out_ref[...] = (jnp.dot(cls, w_fc_ref[...],
                            preferred_element_type=jnp.float32)
                    + b_fc_ref[...]).astype(out_ref.dtype)       # (bm, 4)


def _pick_batch_tile(batch):
    # Batch tile must be a multiple of 8 sublanes, else use the full batch.
    for cand in (256, 128, 64, 32, 16, 8):
        if batch % cand == 0:
            return cand
    return batch


def model_forward(signal, ecg_feature, eog_feature, params,
                  *, signal_dtype=jnp.float32):
    """signal: (B, C, H, W) NCHW;  ecg/eog: (B, F)."""
    B, C, H, W = signal.shape
    F_ = ecg_feature.shape[1]
    K0 = C * H * W
    K = K0 + 2 * F_

    # ---- wrapper-side fusion (plain XLA ops, cheap / constant-foldable) ----
    # Fold the global average pool into the conv weight.
    w_conv_big = jnp.repeat(
        params["w_conv"].astype(jnp.float32) / jnp.float32(H * W),
        H * W, axis=0)                                           # (C*H*W, 4)
    # Block-diagonal merged branch weight: one matmul yields [cls0 | cls1].
    zeros_top_right = jnp.zeros((K0, 4), jnp.float32)
    zeros_bot_left = jnp.zeros((2 * F_, 4), jnp.float32)
    w_big = jnp.concatenate([
        jnp.concatenate([w_conv_big, zeros_top_right], axis=1),  # (K0, 8)
        jnp.concatenate(
            [zeros_bot_left,
             jnp.concatenate([params["w_e"].astype(jnp.float32),
                              params["w_o"].astype(jnp.float32)], axis=0)],
            axis=1),                                             # (2F, 8)
    ], axis=0).astype(signal_dtype)                              # (K, 8)
    b_big = jnp.concatenate(
        [params["b_conv"].reshape(1, -1), params["b_t"].reshape(1, -1)],
        axis=1).astype(jnp.float32)                              # (1, 8)
    w_fc = params["w_fc"].astype(jnp.float32)                    # (8, 4)
    b_fc = params["b_fc"].reshape(1, -1).astype(jnp.float32)     # (1, 4)

    # Lane-dense fused input row: [signal_flat | ecg | eog].
    # (signal_dtype=jnp.bfloat16 halves the HBM read when H*W is large —
    #  mainly a win on v5e/v6e; default stays f32 for exact parity.)
    x = jnp.concatenate(
        [signal.reshape(B, K0), ecg_feature, eog_feature],
        axis=1).astype(signal_dtype)                             # (B, K)

    bm = _pick_batch_tile(B)
    grid = (B // bm,)

    return pl.pallas_call(
        model_kernel,
        out_shape=jax.ShapeDtypeStruct((B, 4), jnp.float32),
        grid=grid,
        in_specs=[
            pl.BlockSpec((bm, K), lambda i: (i, 0)),   # fused input rows
            pl.BlockSpec((K, 8), lambda i: (0, 0)),    # block-diag branch W
            pl.BlockSpec((1, 8), lambda i: (0, 0)),    # merged branch bias
            pl.BlockSpec((8, 4), lambda i: (0, 0)),    # fc weight
            pl.BlockSpec((1, 4), lambda i: (0, 0)),    # fc bias
        ],
        out_specs=pl.BlockSpec((bm, 4), lambda i: (i, 0)),
        compiler_params=pltpu.CompilerParams(
            dimension_semantics=("parallel",)),  # batch tiles -> both TCs (v7x)
    )(x, w_big, b_big, w_fc, b_fc)


def init_params(key, c_in, feat_dim):
    ks = jax.random.split(key, 6)
    scale = 0.1
    return {
        # conv branch head: Linear(C -> 4) applied after global average pool
        "w_conv": scale * jax.random.normal(ks[0], (c_in, 4), jnp.float32),
        "b_conv": scale * jax.random.normal(ks[1], (1, 4), jnp.float32),
        # trans branch: Linear(2*feat_dim -> 4), split per input
        "w_e": scale * jax.random.normal(ks[2], (feat_dim, 4), jnp.float32),
        "w_o": scale * jax.random.normal(ks[3], (feat_dim, 4), jnp.float32),
        "b_t": scale * jax.random.normal(ks[4], (1, 4), jnp.float32),
        # fc: nn.Linear(8, 4), stored as (in, out)
        "w_fc": scale * jax.random.normal(ks[5], (8, 4), jnp.float32),
        "b_fc": jnp.zeros((1, 4), jnp.float32),
    }


def _reference_forward(signal, ecg, eog, params):
    """Pure-JAX reference mirroring the (synthetic) PyTorch forward."""
    B, C, H, W = signal.shape
    pooled = jnp.mean(signal.reshape(B, C, H * W), axis=-1)
    cls0 = pooled @ params["w_conv"] + params["b_conv"]
    cls1 = ecg @ params["w_e"] + eog @ params["w_o"] + params["b_t"]
    cls = jnp.concatenate([cls0, cls1], axis=1)
    cls = 0.5 * cls * (1.0 + lax.erf(cls * 0.7071067811865476))
    return cls @ params["w_fc"] + params["b_fc"]


if __name__ == "__main__":
    key = jax.random.PRNGKey(0)
    k_sig, k_ecg, k_eog, k_par = jax.random.split(key, 4)

    B, C, H, W = 2, 4, 16, 16
    FEAT = 8

    signal = jax.random.normal(k_sig, (B, C, H, W), jnp.float32)
    ecg_feature = jax.random.normal(k_ecg, (B, FEAT), jnp.float32)
    eog_feature = jax.random.normal(k_eog, (B, FEAT), jnp.float32)

    params = init_params(k_par, C, FEAT)

    out = model_forward(signal, ecg_feature, eog_feature, params)
    jax.block_until_ready(out)

    assert out.shape == (B, 4) and out.dtype == jnp.float32
    ref = _reference_forward(signal, ecg_feature, eog_feature, params)
    assert jnp.allclose(out, ref, rtol=1e-2, atol=1e-2), "mismatch vs reference"
    print("KERNEL_OK")
</pallas_src>

<mosaic_0001>
module attributes {stable_mosaic.version = 11 : i64} {
  func.func @model_kernel(%arg0: i32, %arg1: memref<2x1040xf32, #tpu.memory_space<vmem>>, %arg2: memref<1040x8xf32, #tpu.memory_space<vmem>>, %arg3: memref<1x8xf32, #tpu.memory_space<vmem>>, %arg4: memref<8x4xf32, #tpu.memory_space<vmem>>, %arg5: memref<1x4xf32, #tpu.memory_space<vmem>>, %arg6: memref<2x4xf32, #tpu.memory_space<vmem>>) attributes {dimension_semantics = [#tpu.dimension_semantics<parallel>], iteration_bounds = array<i64: 1>, scalar_prefetch = 0 : i64, scratch_operands = 0 : i64, tpu.core_type = #tpu.core_type<tc>, window_params = [{transform_indices = @transform_0, window_bounds = array<i64: 2, 1040>}, {pipeline_mode = #tpu.pipeline_mode<synchronous>, transform_indices = @transform_1, window_bounds = array<i64: 1040, 8>}, {pipeline_mode = #tpu.pipeline_mode<synchronous>, transform_indices = @transform_2, window_bounds = array<i64: 1, 8>}, {pipeline_mode = #tpu.pipeline_mode<synchronous>, transform_indices = @transform_3, window_bounds = array<i64: 8, 4>}, {pipeline_mode = #tpu.pipeline_mode<synchronous>, transform_indices = @transform_4, window_bounds = array<i64: 1, 4>}, {transform_indices = @transform_5, window_bounds = array<i64: 2, 4>}]} {
    %c0 = arith.constant 0 : index
    %c0_0 = arith.constant 0 : index
    %0 = vector.load %arg1[%c0, %c0_0] : memref<2x1040xf32, #tpu.memory_space<vmem>>, vector<2x1040xf32>
    %c0_1 = arith.constant 0 : index
    %c0_2 = arith.constant 0 : index
    %1 = vector.load %arg2[%c0_1, %c0_2] : memref<1040x8xf32, #tpu.memory_space<vmem>>, vector<1040x8xf32>
    %cst = arith.constant dense<0.000000e+00> : vector<2x8xf32>
    %2 = tpu.matmul %0, %1, %cst {dimension_numbers = #tpu.dot_dimension_numbers<[1], [0], [0], [1], [0, 0, 1, 1], [], []>} : vector<2x1040xf32>, vector<1040x8xf32>, vector<2x8xf32> -> vector<2x8xf32>
    %c0_3 = arith.constant 0 : index
    %c0_4 = arith.constant 0 : index
    %3 = vector.load %arg3[%c0_3, %c0_4] : memref<1x8xf32, #tpu.memory_space<vmem>>, vector<1x8xf32>
    %4 = vector.broadcast %3 : vector<1x8xf32> to vector<2x8xf32>
    %5 = arith.addf %2, %4 : vector<2x8xf32>
    %cst_5 = arith.constant 5.000000e-01 : f32
    %6 = vector.broadcast %cst_5 : f32 to vector<2x8xf32>
    %7 = arith.mulf %6, %5 : vector<2x8xf32>
    %cst_6 = arith.constant 0.707106769 : f32
    %8 = vector.broadcast %cst_6 : f32 to vector<2x8xf32>
    %9 = arith.mulf %5, %8 : vector<2x8xf32>
    %10 = math.erf %9 : vector<2x8xf32>
    %cst_7 = arith.constant 1.000000e+00 : f32
    %11 = vector.broadcast %cst_7 : f32 to vector<2x8xf32>
    %12 = arith.addf %11, %10 : vector<2x8xf32>
    %13 = arith.mulf %7, %12 : vector<2x8xf32>
    %c0_8 = arith.constant 0 : index
    %c0_9 = arith.constant 0 : index
    %14 = vector.load %arg4[%c0_8, %c0_9] : memref<8x4xf32, #tpu.memory_space<vmem>>, vector<8x4xf32>
    %cst_10 = arith.constant dense<0.000000e+00> : vector<2x4xf32>
    %15 = tpu.matmul %13, %14, %cst_10 {dimension_numbers = #tpu.dot_dimension_numbers<[1], [0], [0], [1], [0, 0, 1, 1], [], []>} : vector<2x8xf32>, vector<8x4xf32>, vector<2x4xf32> -> vector<2x4xf32>
    %c0_11 = arith.constant 0 : index
    %c0_12 = arith.constant 0 : index
    %16 = vector.load %arg5[%c0_11, %c0_12] : memref<1x4xf32, #tpu.memory_space<vmem>>, vector<1x4xf32>
    %17 = vector.broadcast %16 : vector<1x4xf32> to vector<2x4xf32>
    %18 = arith.addf %15, %17 : vector<2x4xf32>
    %c0_13 = arith.constant 0 : index
    %c0_14 = arith.constant 0 : index
    %19 = vector.load %arg6[%c0_13, %c0_14] : memref<2x4xf32, #tpu.memory_space<vmem>>, vector<2x4xf32>
    tpu.vector_store %arg6[%c0_13, %c0_14], %18 {strides = array<i32>} : memref<2x4xf32, #tpu.memory_space<vmem>>, vector<2x4xf32>,
    return
  }
  func.func @transform_0(%arg0: i32) -> (i32, i32) {
    %c0_i32 = arith.constant 0 : i32
    %c0_i32_0 = arith.constant 0 : i32
    return %arg0, %c0_i32 : i32, i32
  }
  func.func @transform_1(%arg0: i32) -> (i32, i32) {
    %c0_i32 = arith.constant 0 : i32
    %c0_i32_0 = arith.constant 0 : i32
    %c0_i32_1 = arith.constant 0 : i32
    return %c0_i32, %c0_i32_0 : i32, i32
  }
  func.func @transform_2(%arg0: i32) -> (i32, i32) {
    %c0_i32 = arith.constant 0 : i32
    %c0_i32_0 = arith.constant 0 : i32
    %c0_i32_1 = arith.constant 0 : i32
    return %c0_i32, %c0_i32_0 : i32, i32
  }
  func.func @transform_3(%arg0: i32) -> (i32, i32) {
    %c0_i32 = arith.constant 0 : i32
    %c0_i32_0 = arith.constant 0 : i32
    %c0_i32_1 = arith.constant 0 : i32
    return %c0_i32, %c0_i32_0 : i32, i32
  }
  func.func @transform_4(%arg0: i32) -> (i32, i32) {
    %c0_i32 = arith.constant 0 : i32
    %c0_i32_0 = arith.constant 0 : i32
    %c0_i32_1 = arith.constant 0 : i32
    return %c0_i32, %c0_i32_0 : i32, i32
  }
  func.func @transform_5(%arg0: i32) -> (i32, i32) {
    %c0_i32 = arith.constant 0 : i32
    %c0_i32_0 = arith.constant 0 : i32
    return %arg0, %c0_i32 : i32, i32
  }
}

</mosaic_0001>

<bundles_post_ra>
// kernel: tpu_custom_call.1
= control target key start
LH: loop header
LB: loop body
LE: loop exit
PB: predicated region body
PF: predicated region fallthrough
CT: control target
= control target key end

     0   :  { %v861_v30 = vmov 1983009808   ;;  %v168_v32 = vlaneseq  ;;  %s1312_s0 = inlined_call_operand.vmem [shape: f32[2,1040], index: 0, kind: input, shape index: {}]   ;;  %s1313_s1 = inlined_call_operand.vmem [shape: f32[1040,8], index: 1, kind: input, shape index: {}]   ;;  %s1314_s2 = inlined_call_operand.vmem [shape: f32[1,8], index: 2, kind: input, shape index: {}]   ;;  %s1315_s3 = inlined_call_operand.vmem [shape: f32[8,4], index: 3, kind: input, shape index: {}]   ;;  %s1316_s4 = inlined_call_operand.vmem [shape: f32[1,4], index: 4, kind: input, shape index: {}]   ;;  %s1317_s5 = inlined_call_operand.hbm [shape: f32[2,4], index: 5, kind: output, shape index: {}]  }
   0x1   :  { %v55_v0 = vld [vmem:[%s1313_s1 + $0xf8] sm:$0xff]  ;;  %v54_v4 = vld [vmem:[%s1313_s1 + $0xf0] sm:$0xff]  ;;  %v53_v8 = vld [vmem:[%s1313_s1 + $0xe8] sm:$0xff]  ;;  %v166_v31 = vunpack.c.l.s4 %v861_v30 }
   0x2   :  { %v87_v1 = vld [vmem:[%s1313_s1 + $0x1f8] sm:$0xff]  ;;  %674 = vmatprep.subr.mxu0 %v55_v0  ;;  %v86_v5 = vld [vmem:[%s1313_s1 + $0x1f0] sm:$0xff]  ;;  %v85_v9 = vld [vmem:[%s1313_s1 + $0x1e8] sm:$0xff]  ;;  %v169_v42 = vshrl.u32 %v168_v32, 7 }
   0x3   :  { %v39_v2 = vld [vmem:[%s1313_s1 + $0x78] sm:$0xff]  ;;  %709 = vmatprep.subr.mxu1 %v87_v1  ;;  %v38_v6 = vld [vmem:[%s1313_s1 + $0x70] sm:$0xff]  ;;  %v37_v10 = vld [vmem:[%s1313_s1 + $0x68] sm:$0xff]  ;;  %v167_v41 = vunpack.c.0.s8 %v166_v31 }
   0x4   :  { %v71_v3 = vld [vmem:[%s1313_s1 + $0x178] sm:$0xff]  ;;  %675 = vmatpush3.msra.mxu0 %v39_v2  ;;  %v70_v7 = vld [vmem:[%s1313_s1 + $0x170] sm:$0xff]  ;;  %v69_v11 = vld [vmem:[%s1313_s1 + $0x168] sm:$0xff] }
   0x5   :  { %710 = vmatpush3.msra.mxu1 %v71_v3  ;;  %676 = vmatprep.subr.mxu0 %v54_v4  ;;  %v52_v12 = vld [vmem:[%s1313_s1 + $0xe0] sm:$0xff]  ;;  %v51_v16 = vld [vmem:[%s1313_s1 + $0xd8] sm:$0xff]  ;;  %v50_v20 = vld [vmem:[%s1313_s1 + $0xd0] sm:$0xff]  ;;  %v1033_v51 = vsub.s32 %v167_v41, %v169_v42 }
   0x6   :  { %711 = vmatprep.subr.mxu1 %v86_v5  ;;  %677 = vmatpush3.msra.mxu0 %v38_v6  ;;  %v84_v13 = vld [vmem:[%s1313_s1 + $0x1e0] sm:$0xff]  ;;  %v83_v17 = vld [vmem:[%s1313_s1 + $0x1d8] sm:$0xff]  ;;  %v82_v21 = vld [vmem:[%s1313_s1 + $0x1d0] sm:$0xff] }
   0x7   :  { %712 = vmatpush3.msra.mxu1 %v70_v7  ;;  %678 = vmatprep.subr.mxu0 %v53_v8  ;;  %v36_v14 = vld [vmem:[%s1313_s1 + $0x60] sm:$0xff]  ;;  %v35_v18 = vld [vmem:[%s1313_s1 + $0x58] sm:$0xff]  ;;  %v34_v22 = vld [vmem:[%s1313_s1 + $0x50] sm:$0xff] }
   0x8   :  { %713 = vmatprep.subr.mxu1 %v85_v9  ;;  %v68_v15 = vld [vmem:[%s1313_s1 + $0x160] sm:$0xff]  ;;  %679 = vmatpush3.msra.mxu0 %v37_v10  ;;  %v67_v19 = vld [vmem:[%s1313_s1 + $0x158] sm:$0xff]  ;;  %v66_v23 = vld [vmem:[%s1313_s1 + $0x150] sm:$0xff] }
   0x9   :  { %714 = vmatpush3.msra.mxu1 %v69_v11  ;;  %680 = vmatprep.subr.mxu0 %v52_v12  ;;  %v49_v24 = vld [vmem:[%s1313_s1 + $0xc8] sm:$0xff]  ;;  %v48_v28 = vld [vmem:[%s1313_s1 + $0xc0] sm:$0xff]  ;;  %v47_v35 = vld [vmem:[%s1313_s1 + $0xb8] sm:$0xff] }
   0xa   :  { %715 = vmatprep.subr.mxu1 %v84_v13  ;;  %681 = vmatpush3.msra.mxu0 %v36_v14  ;;  %v81_v25 = vld [vmem:[%s1313_s1 + $0x1c8] sm:$0xff]  ;;  %v80_v29 = vld [vmem:[%s1313_s1 + $0x1c0] sm:$0xff]  ;;  %v79_v36 = vld [vmem:[%s1313_s1 + $0x1b8] sm:$0xff] }
   0xb   :  { %716 = vmatpush3.msra.mxu1 %v68_v15  ;;  %682 = vmatprep.subr.mxu0 %v51_v16  ;;  %v33_v26 = vld [vmem:[%s1313_s1 + $0x48] sm:$0xff]  ;;  %v32_v33 = vld [vmem:[%s1313_s1 + $0x40] sm:$0xff]  ;;  %v31_v37 = vld [vmem:[%s1313_s1 + $0x38] sm:$0xff] }
   0xc   :  { %717 = vmatprep.subr.mxu1 %v83_v17  ;;  %683 = vmatpush3.msra.mxu0 %v35_v18  ;;  %v65_v27 = vld [vmem:[%s1313_s1 + $0x148] sm:$0xff]  ;;  %v64_v34 = vld [vmem:[%s1313_s1 + $0x140] sm:$0xff]  ;;  %v63_v38 = vld [vmem:[%s1313_s1 + $0x138] sm:$0xff] }
   0xd   :  { %718 = vmatpush3.msra.mxu1 %v67_v19  ;;  %684 = vmatprep.subr.mxu0 %v50_v20  ;;  %v46_v39 = vld [vmem:[%s1313_s1 + $0xb0] sm:$0xff]  ;;  %v45_v45 = vld [vmem:[%s1313_s1 + $0xa8] sm:$0xff]  ;;  %v44_v49 = vld [vmem:[%s1313_s1 + $0xa0] sm:$0xff] }
   0xe   :  { %719 = vmatprep.subr.mxu1 %v82_v21  ;;  %685 = vmatpush3.msra.mxu0 %v34_v22  ;;  %v78_v40 = vld [vmem:[%s1313_s1 + $0x1b0] sm:$0xff]  ;;  %v77_v46 = vld [vmem:[%s1313_s1 + $0x1a8] sm:$0xff]  ;;  %v76_v50 = vld [vmem:[%s1313_s1 + $0x1a0] sm:$0xff] }
   0xf   :  { %720 = vmatpush3.msra.mxu1 %v66_v23  ;;  %686 = vmatprep.subr.mxu0 %v49_v24  ;;  %v30_v43 = vld [vmem:[%s1313_s1 + $0x30] sm:$0xff]  ;;  %v29_v47 = vld [vmem:[%s1313_s1 + $0x28] sm:$0xff]  ;;  %v28_v52 = vld [vmem:[%s1313_s1 + $0x20] sm:$0xff] }
  0x10   :  { %721 = vmatprep.subr.mxu1 %v81_v25  ;;  %687 = vmatpush3.msra.mxu0 %v33_v26  ;;  %v62_v44 = vld [vmem:[%s1313_s1 + $0x130] sm:$0xff]  ;;  %v61_v48 = vld [vmem:[%s1313_s1 + $0x128] sm:$0xff]  ;;  %v60_v53 = vld [vmem:[%s1313_s1 + $0x120] sm:$0xff] }
  0x11   :  { %722 = vmatpush3.msra.mxu1 %v65_v27  ;;  %688 = vmatprep.subr.mxu0 %v48_v28  ;;  %v21_v54 = vld [vmem:[%s1312_s0] sm:$0xff]  ;;  %v43_v55 = vld [vmem:[%s1313_s1 + $0x98] sm:$0xff]  ;;  %v42_v60 = vld [vmem:[%s1313_s1 + $0x90] sm:$0xff] }
  0x12   :  { %723 = vmatprep.subr.mxu1 %v80_v29  ;;  %689 = vmatpush3.msra.mxu0 %v32_v33  ;;  %v75_v56 = vld [vmem:[%s1313_s1 + $0x198] sm:$0xff]  ;;  %v164_v57 = vcombine.high %v21_v54, %v21_v54  ;;  %v74_v61 = vld [vmem:[%s1313_s1 + $0x190] sm:$0xff]  ;;  %v171_v62 = vrot.slane %v21_v54, %v1033_v51  ;;  %v41_v1 = vld [vmem:[%s1313_s1 + $0x88] sm:$0xff] }
  0x13   :  { %724 = vmatpush3.msra.mxu1 %v64_v34  ;;  %690 = vmatprep.subr.mxu0 %v47_v35  ;;  %v27_v58 = vld [vmem:[%s1313_s1 + $0x18] sm:$0xff]  ;;  %v26_v63 = vld [vmem:[%s1313_s1 + $0x10] sm:$0xff]  ;;  %v73_v2 = vld [vmem:[%s1313_s1 + $0x188] sm:$0xff] }
  0x14   :  { %725 = vmatprep.subr.mxu1 %v79_v36  ;;  %691 = vmatpush3.msra.mxu0 %v31_v37  ;;  %v59_v59 = vld [vmem:[%s1313_s1 + $0x118] sm:$0xff]  ;;  %v58_v0 = vld [vmem:[%s1313_s1 + $0x110] sm:$0xff]  ;;  %v178_v3 = vrot.slane %v164_v57, %v1033_v51  ;;  %v25_v4 = vld [vmem:[%s1313_s1 + $0x8] sm:$0xff]  ;;  %v179_v8 = vcombine.high %v171_v62, %v171_v62 }
  0x15   :  { %726 = vmatpush3.msra.mxu1 %v63_v38  ;;  %692 = vmatprep.subr.mxu0 %v46_v39  ;;  %v57_v5 = vld [vmem:[%s1313_s1 + $0x108] sm:$0xff]  ;;  %v40_v6 = vld [vmem:[%s1313_s1 + $0x80] sm:$0xff]  ;;  %v119_v12 = vld [vmem:[%s1313_s1 + $0x2f8] sm:$0xff] }
  0x16   :  { %727 = vmatprep.subr.mxu1 %v78_v40  ;;  %693 = vmatpush3.msra.mxu0 %v30_v43  ;;  %v72_v7 = vld [vmem:[%s1313_s1 + $0x180] sm:$0xff]  ;;  %v180_v11 = vcombine.high %v178_v3, %v178_v3  ;;  %v151_v13 = vld [vmem:[%s1313_s1 + $0x3f8] sm:$0xff]  ;;  %v118_v16 = vld [vmem:[%s1313_s1 + $0x2f0] sm:$0xff] }
  0x17   :  { %728 = vmatpush3.msra.mxu1 %v62_v44  ;;  %694 = vmatprep.subr.mxu0 %v45_v45  ;;  %v24_v9 = vld [vmem:[%s1313_s1] sm:$0xff]  ;;  %v103_v14 = vld [vmem:[%s1313_s1 + $0x278] sm:$0xff]  ;;  %v150_v17 = vld [vmem:[%s1313_s1 + $0x3f0] sm:$0xff] }
  0x18   :  { %729 = vmatprep.subr.mxu1 %v77_v46  ;;  %695 = vmatpush3.msra.mxu0 %v29_v47  ;;  %v56_v10 = vld [vmem:[%s1313_s1 + $0x100] sm:$0xff]  ;;  %v135_v15 = vld [vmem:[%s1313_s1 + $0x378] sm:$0xff]  ;;  %v102_v18 = vld [vmem:[%s1313_s1 + $0x270] sm:$0xff] }
  0x19   :  { %730 = vmatpush3.msra.mxu1 %v61_v48  ;;  %696 = vmatprep.subr.mxu0 %v44_v49  ;;  %v134_v19 = vld [vmem:[%s1313_s1 + $0x370] sm:$0xff]  ;;  %v117_v20 = vld [vmem:[%s1313_s1 + $0x2e8] sm:$0xff]  ;;  %v116_v24 = vld [vmem:[%s1313_s1 + $0x2e0] sm:$0xff] }
  0x1a   :  { %731 = vmatprep.subr.mxu1 %v76_v50  ;;  %697 = vmatpush3.msra.mxu0 %v28_v52  ;;  %v149_v21 = vld [vmem:[%s1313_s1 + $0x3e8] sm:$0xff]  ;;  %v148_v25 = vld [vmem:[%s1313_s1 + $0x3e0] sm:$0xff]  ;;  %v115_v28 = vld [vmem:[%s1313_s1 + $0x2d8] sm:$0xff] }
  0x1b   :  { %732 = vmatpush3.msra.mxu1 %v60_v53  ;;  %698 = vmatprep.subr.mxu0 %v43_v55  ;;  %v101_v22 = vld [vmem:[%s1313_s1 + $0x268] sm:$0xff]  ;;  %v100_v26 = vld [vmem:[%s1313_s1 + $0x260] sm:$0xff]  ;;  %v147_v29 = vld [vmem:[%s1313_s1 + $0x3d8] sm:$0xff] }
  0x1c   :  { %733 = vmatprep.subr.mxu1 %v75_v56  ;;  %699 = vmatpush3.msra.mxu0 %v27_v58  ;;  %v133_v23 = vld [vmem:[%s1313_s1 + $0x368] sm:$0xff]  ;;  %v132_v27 = vld [vmem:[%s1313_s1 + $0x360] sm:$0xff]  ;;  %v99_v30 = vld [vmem:[%s1313_s1 + $0x258] sm:$0xff] }
  0x1d   :  { %734 = vmatpush3.msra.mxu1 %v59_v59  ;;  %700 = vmatprep.subr.mxu0 %v42_v60  ;;  %v131_v31 = vld [vmem:[%s1313_s1 + $0x358] sm:$0xff]  ;;  %v114_v32 = vld [vmem:[%s1313_s1 + $0x2d0] sm:$0xff]  ;;  %v113_v36 = vld [vmem:[%s1313_s1 + $0x2c8] sm:$0xff] }
  0x1e   :  { %735 = vmatprep.subr.mxu1 %v74_v61  ;;  %701 = vmatpush3.msra.mxu0 %v26_v63  ;;  %v146_v33 = vld [vmem:[%s1313_s1 + $0x3d0] sm:$0xff]  ;;  %v145_v37 = vld [vmem:[%s1313_s1 + $0x3c8] sm:$0xff] }
  0x1f   :  { %736 = vmatpush3.msra.mxu1 %v58_v0  ;;  %702 = vmatprep.subr.mxu0 %v41_v1  ;;  %v98_v34 = vld [vmem:[%s1313_s1 + $0x250] sm:$0xff] }
  0x20   :  { %737 = vmatprep.subr.mxu1 %v73_v2  ;;  %703 = vmatpush3.msra.mxu0 %v25_v4  ;;  %v130_v35 = vld [vmem:[%s1313_s1 + $0x350] sm:$0xff] }
  0x21   :  { %738 = vmatpush3.msra.mxu1 %v57_v5  ;;  %704 = vmatprep.subr.mxu0 %v40_v6 }
  0x22   :  { %739 = vmatprep.subr.mxu1 %v72_v7  ;;  %705 = vmatpush3.msra.mxu0 %v24_v9 }
  0x23   :  { %280 = vmatprep.mubr.f32.mxu0 %v179_v8  ;;  %740 = vmatpush3.msra.mxu1 %v56_v10 }
  0x24   :  { %281 = vmatmul.mubr.f32.vlgmr.msra.gmra.mxu0 %v171_v62  ;;  %350 = vmatprep.mubr.f32.mxu1 %v180_v11 }
  0x25   :  { %744 = vmatprep.subr.mxu0 %v119_v12  ;;  %779 = vmatprep.subr.mxu1 %v151_v13 }
  0x26   :  { %351 = vmatmul.mubr.f32.vlgmr.msra.gmra.mxu1 %v178_v3  ;;  %745 = vmatpush3.msra.mxu0 %v103_v14 }
  0x27   :  { %780 = vmatpush3.msra.mxu1 %v135_v15  ;;  %746 = vmatprep.subr.mxu0 %v118_v16 }
  0x28   :  { %781 = vmatprep.subr.mxu1 %v150_v17  ;;  %747 = vmatpush3.msra.mxu0 %v102_v18 }
  0x29   :  { %782 = vmatpush3.msra.mxu1 %v134_v19  ;;  %748 = vmatprep.subr.mxu0 %v117_v20 }
  0x2a   :  { %783 = vmatprep.subr.mxu1 %v149_v21  ;;  %749 = vmatpush3.msra.mxu0 %v101_v22 }
  0x2b   :  { %784 = vmatpush3.msra.mxu1 %v133_v23  ;;  %750 = vmatprep.subr.mxu0 %v116_v24 }
  0x2c   :  { %785 = vmatprep.subr.mxu1 %v148_v25  ;;  %751 = vmatpush3.msra.mxu0 %v100_v26 }
  0x2d   :  { %786 = vmatpush3.msra.mxu1 %v132_v27  ;;  %752 = vmatprep.subr.mxu0 %v115_v28 }
  0x2e   :  { %787 = vmatprep.subr.mxu1 %v147_v29  ;;  %753 = vmatpush3.msra.mxu0 %v99_v30 }
  0x2f   :  { %788 = vmatpush3.msra.mxu1 %v131_v31 }
  0x30   :  { %10 = vsyncpa [#allocation3], 0  ;;  %754 = vmatprep.subr.mxu0 %v114_v32  ;;  %789 = vmatprep.subr.mxu1 %v146_v33  ;;  %v97_v38 = vld [vmem:[%s1313_s1 + $0x248] sm:$0xff]  ;;  %v112_v40 = vld [vmem:[%s1313_s1 + $0x2c0] sm:$0xff]  ;;  %v862_v19 = vmov 0.0   ;;  %vm863_vm0 = vmmov 0  }
  0x31   :  { %v129_v39 = vld [vmem:[%s1313_s1 + $0x348] sm:$0xff]  ;;  %755 = vmatpush3.msra.mxu0 %v98_v34  ;;  %790 = vmatpush3.msra.mxu1 %v130_v35  ;;  %v144_v41 = vld [vmem:[%s1313_s1 + $0x3c0] sm:$0xff]  ;;  %v111_v44 = vld [vmem:[%s1313_s1 + $0x2b8] sm:$0xff]  ;;  %vm213_vm1 = vcmask 130048   ;;  %vm579_vm2 = vcmask 64512   ;;  %vm653_vm3 = vcmask 25600  }
  0x32   :  { %756 = vmatprep.subr.mxu0 %v113_v36  ;;  %791 = vmatprep.subr.mxu1 %v145_v37  ;;  %v96_v42 = vld [vmem:[%s1313_s1 + $0x240] sm:$0xff]  ;;  %v143_v45 = vld [vmem:[%s1313_s1 + $0x3b8] sm:$0xff]  ;;  %v110_v48 = vld [vmem:[%s1313_s1 + $0x2b0] sm:$0xff] }
  0x33   :  { %v128_v43 = vld [vmem:[%s1313_s1 + $0x340] sm:$0xff]  ;;  %757 = vmatpush3.msra.mxu0 %v97_v38  ;;  %792 = vmatpush3.msra.mxu1 %v129_v39  ;;  %v95_v46 = vld [vmem:[%s1313_s1 + $0x238] sm:$0xff]  ;;  %v142_v49 = vld [vmem:[%s1313_s1 + $0x3b0] sm:$0xff] }
  0x34   :  { %758 = vmatprep.subr.mxu0 %v112_v40  ;;  %793 = vmatprep.subr.mxu1 %v144_v41  ;;  %v127_v47 = vld [vmem:[%s1313_s1 + $0x338] sm:$0xff]  ;;  %v94_v50 = vld [vmem:[%s1313_s1 + $0x230] sm:$0xff]  ;;  %v109_v53 = vld [vmem:[%s1313_s1 + $0x2a8] sm:$0xff] }
  0x35   :  { %759 = vmatpush3.msra.mxu0 %v96_v42  ;;  %794 = vmatpush3.msra.mxu1 %v128_v43  ;;  %v126_v52 = vld [vmem:[%s1313_s1 + $0x330] sm:$0xff]  ;;  %v141_v54 = vld [vmem:[%s1313_s1 + $0x3a8] sm:$0xff]  ;;  %v108_v58 = vld [vmem:[%s1313_s1 + $0x2a0] sm:$0xff] }
  0x36   :  { %760 = vmatprep.subr.mxu0 %v111_v44  ;;  %795 = vmatprep.subr.mxu1 %v143_v45  ;;  %v22_v55 = vld [vmem:[%s1312_s0 + $0x8] sm:$0xff]  ;;  %v140_v59 = vld [vmem:[%s1313_s1 + $0x3a0] sm:$0xff]  ;;  %v107_v63 = vld [vmem:[%s1313_s1 + $0x298] sm:$0xff] }
  0x37   :  { %761 = vmatpush3.msra.mxu0 %v95_v46  ;;  %796 = vmatpush3.msra.mxu1 %v127_v47  ;;  %v93_v56 = vld [vmem:[%s1313_s1 + $0x228] sm:$0xff]  ;;  %v92_v60 = vld [vmem:[%s1313_s1 + $0x220] sm:$0xff]  ;;  %v181_v62 = vcombine.high %v22_v55, %v22_v55  ;;  %v139_v0 = vld [vmem:[%s1313_s1 + $0x398] sm:$0xff]  ;;  %v188_v5 = vrot.slane %v22_v55, %v1033_v51 }
  0x38   :  { %762 = vmatprep.subr.mxu0 %v110_v48  ;;  %797 = vmatprep.subr.mxu1 %v142_v49  ;;  %v125_v57 = vld [vmem:[%s1313_s1 + $0x328] sm:$0xff]  ;;  %v124_v61 = vld [vmem:[%s1313_s1 + $0x320] sm:$0xff]  ;;  %v91_v1 = vld [vmem:[%s1313_s1 + $0x218] sm:$0xff] }
  0x39   :  { %763 = vmatpush3.msra.mxu0 %v94_v50  ;;  %798 = vmatpush3.msra.mxu1 %v126_v52  ;;  %v123_v2 = vld [vmem:[%s1313_s1 + $0x318] sm:$0xff]  ;;  %v106_v3 = vld [vmem:[%s1313_s1 + $0x290] sm:$0xff]  ;;  %v195_v8 = vrot.slane %v181_v62, %v1033_v51  ;;  %v105_v9 = vld [vmem:[%s1313_s1 + $0x288] sm:$0xff]  ;;  %v196_v14 = vcombine.high %v188_v5, %v188_v5 }
  0x3a   :  { %764 = vmatprep.subr.mxu0 %v109_v53  ;;  %799 = vmatprep.subr.mxu1 %v141_v54  ;;  %v138_v4 = vld [vmem:[%s1313_s1 + $0x390] sm:$0xff]  ;;  %v137_v10 = vld [vmem:[%s1313_s1 + $0x388] sm:$0xff]  ;;  %v104_v12 = vld [vmem:[%s1313_s1 + $0x280] sm:$0xff] }
  0x3b   :  { %765 = vmatpush3.msra.mxu0 %v93_v56  ;;  %800 = vmatpush3.msra.mxu1 %v125_v57  ;;  %v90_v6 = vld [vmem:[%s1313_s1 + $0x210] sm:$0xff]  ;;  %v89_v11 = vld [vmem:[%s1313_s1 + $0x208] sm:$0xff]  ;;  %v136_v13 = vld [vmem:[%s1313_s1 + $0x380] sm:$0xff]  ;;  %v197_v16 = vcombine.high %v195_v8, %v195_v8 }
  0x3c   :  { %766 = vmatprep.subr.mxu0 %v108_v58  ;;  %801 = vmatprep.subr.mxu1 %v140_v59  ;;  %v122_v7 = vld [vmem:[%s1313_s1 + $0x310] sm:$0xff]  ;;  %v121_v51 = vld [vmem:[%s1313_s1 + $0x308] sm:$0xff]  ;;  %v88_v15 = vld [vmem:[%s1313_s1 + $0x200] sm:$0xff] }
  0x3d   :  { %767 = vmatpush3.msra.mxu0 %v92_v60  ;;  %802 = vmatpush3.msra.mxu1 %v124_v61  ;;  %v120_v17 = vld [vmem:[%s1313_s1 + $0x300] sm:$0xff]  ;;  %v153_v18 = vld [vmem:[%s1313_s1 + $0x408] sm:$0xff]  ;;  %v670_v21 = vld.sshfl [vmem:[%s1312_s0 + $0x10] sm:$0x3 pattern:$0x76325410] }
  0x3e   :  { %768 = vmatprep.subr.mxu0 %v107_v63  ;;  %803 = vmatprep.subr.mxu1 %v139_v0  ;;  %v152_v20 = vld [vmem:[%s1313_s1 + $0x400] sm:$0xff] }
  0x3f   :  { %769 = vmatpush3.msra.mxu0 %v91_v1  ;;  %804 = vmatpush3.msra.mxu1 %v123_v2  ;;  %v571_v22 = vld [vmem:[%s1315_s3] sm:$0xff]  ;;  %s864_s3 = smov [#allocation2]  }
  0x40   :  { %770 = vmatprep.subr.mxu0 %v106_v3  ;;  %805 = vmatprep.subr.mxu1 %v138_v4  ;;  %v669_v27 = vld [vmem:[%s1314_s2] ss:$0 sm:$0xff]  ;;  %s661_s12 = sshll.u32 %s864_s3, 4  ;;  %s662_s12 = int_to_ptr.vmem [resolvable:$true] %s661_s12 }
  0x41   :  { %771 = vmatpush3.msra.mxu0 %v90_v6  ;;  %806 = vmatpush3.msra.mxu1 %v122_v7  ;;  %v672_v48 = vld [vmem:[%s1316_s4] ss:$0 sm:$0xff]  ;;  %s839_s13 = scalar_lea.vmem %s662_s12, 32  ;;  %p844_p1 = scmp.lt.s32.totalorder %s662_s12, %s662_s12 }
  0x42   :  { %772 = vmatprep.subr.mxu0 %v105_v9  ;;  %807 = vmatprep.subr.mxu1 %v137_v10  ;;  %p840_p0 = scmp.ne.s32.totalorder %s662_s12, %s839_s13  ;;  %p845_p2 = scmp.lt.s32.totalorder %s839_s13, %s839_s13 }
  0x43   :  { %773 = vmatpush3.msra.mxu0 %v89_v11  ;;  %808 = vmatpush3.msra.mxu1 %v121_v51 }
  0x44   :  { %774 = vmatprep.subr.mxu0 %v104_v12  ;;  %809 = vmatprep.subr.mxu1 %v136_v13  ;;  %p846_p3 = por %p845_p2, %p844_p1 }
  0x45   :  { %775 = vmatpush3.msra.mxu0 %v88_v15  ;;  %420 = vmatprep.mubr.f32.mxu0 %v196_v14 }
  0x46   :  { %810 = vmatpush3.msra.mxu1 %v120_v17  ;;  %490 = vmatprep.mubr.f32.mxu1 %v197_v16  ;;  %p847_p4 = pnand %p846_p3, %p840_p0 }
  0x47   :  { %421 = vmatmul.mubr.f32.vlgmr.msra.gmra.mxu0 %v188_v5  ;;  %491 = vmatmul.mubr.f32.vlgmr.msra.gmra.mxu1 %v195_v8 }
  0x48   :  { %819 = vmatprep.subr.mxu0 %v862_v19  ;;  %823 = vmatprep.mubr.msk.f32.mxu0 %vm863_vm0, %v862_v19 }
  0x49   :  { %820 = vmatpush3.msra.mxu0 %v153_v18  ;;  %826 = vmatprep.subr.mxu1 %v862_v19 }
  0x4a   :  { %821 = vmatprep.subr.mxu0 %v862_v19  ;;  %828 = vmatprep.mubr.msk.f32.mxu1 %vm863_vm0, %v862_v19 }
  0x4b   :  { %822 = vmatpush3.msra.mxu0 %v152_v20  ;;  %827 = vmatpush3.msra.mxu1 %v571_v22 }
  0x4c   :  { %824 = vmatmul.mubr.msk.f32.vlgmr.msra.gmra.mxu0 %vm213_vm1, %v670_v21 }
  0xe4   :  { %v706_v23 = vpop.f32.mrf.mxu0 }
  0xe6   :  { %v741_v24 = vpop.f32.mrf.mxu1  ;;  %v707_v25 = vpop.f32.mrf.mxu0 }
  0xe7   :  { %v708_v26 = vadd.f32 %v707_v25, %v706_v23 }
  0xe8   :  { %v742_v28 = vpop.f32.mrf.mxu1 }
  0xe9   :  { %v283_v29 = vadd.f32 %v708_v26, %v669_v27  ;;  %v743_v30 = vadd.f32 %v742_v28, %v741_v24 }
  0xeb   :  { %v353_v35 = vadd.f32 %v743_v30, %v283_v29 }
 0x107   :  { %v776_v31 = vpop.f32.mrf.mxu0  ;;  %v811_v32 = vpop.f32.mrf.mxu1 }
 0x109   :  { %v777_v33 = vpop.f32.mrf.mxu0  ;;  %v812_v34 = vpop.f32.mrf.mxu1 }
 0x10a   :  { %v778_v36 = vadd.f32 %v777_v33, %v776_v31  ;;  %v813_v38 = vadd.f32 %v812_v34, %v811_v32 }
 0x10c   :  { %v423_v37 = vadd.f32 %v778_v36, %v353_v35  ;;  %v562_v39 = vpop.f32.mrf.mxu0 }
 0x10e   :  { %v493_v40 = vadd.f32 %v813_v38, %v423_v37  ;;  %v825_v41 = vpop.f32.mrf.mxu0 }
 0x110   :  { %v563_v42 = vadd.f32 %v562_v39, %v493_v40 }
 0x112   :  { %v567_v43 = vmul.f32 0.70710677, %v563_v42  ;;  %v566_v45 = vmul.f32 0.5, %v563_v42 }
 0x114   :  { %837 = verf.f32 %v567_v43 }
 0x121   :  { %v838_v44 = vpop.eup %837 }
 0x122   :  { %v569_v46 = vadd.f32 1.0, %v838_v44 }
 0x124   :  { %v570_v47 = vmul.f32 %v569_v46, %v566_v45 }
 0x126   :  { %829 = vmatmul.mubr.msk.f32.vlgmr.msra.gmra.mxu1 %vm579_vm2, %v570_v47 }
 0x1e6   :  { %v649_v49 = vpop.f32.mrf.mxu1 }
 0x1e7   :  { %v650_v50 = vadd.f32 %v672_v48, %v649_v49 }
 0x1e8   :  { %v830_v52 = vpop.f32.mrf.mxu1 }
 0x1e9   :  { %654 = vst.msk [vmem:[#allocation2] sm:$0x3] %vm653_vm3, %v650_v50 }
 0x1ea   :  { %850 = shalt.err (!%p847_p4)
}
 0x1eb   :  { %664 = dma.vmem_to_hbm [thread:$0]  %s662_s12, 32, %s1317_s5, [#allocation3]  }
 0x1ec   :  { %859 = dma.done.wait [#allocation3], 32  }
 0x1ed   :  { %860 = vsyncadd [#allocation3], 4294967264 }
 0x1ee   :  { %668 = vsyncpa [#allocation3], 1 }

</bundles_post_ra>
